<compile_context>
chip_gen: v5e
topology: v5e:2x2
jax: 0.10.0
libtpu: 0.0.40
codegen_flags: <defaults>
</compile_context>

<pallas_src>
import functools

import jax
import jax.numpy as jnp
from jax.experimental import pallas as pl
from jax.experimental.pallas import tpu as pltpu

_LANES = 128
_SUBLANES = 8


def _round_up(x, m):
    return ((x + m - 1) // m) * m


def _hinge_sum_f32(pos, neg, margin_f32):
    """sum(max(0, pos - neg + margin)) in f32 (fused path / tail epilogue)."""
    diff = pos.astype(jnp.float32) - neg.astype(jnp.float32)
    return jnp.sum(jnp.maximum(diff + margin_f32, 0.0))


def _tensorcores_per_chip():
    """2 on chips whose 'parallel' grid axis spans two TensorCores, else 1."""
    try:
        kind = jax.devices()[0].device_kind.lower()
    except Exception:  # pragma: no cover - defensive; default to single TC.
        return 1
    if "v7" in kind or "v4" in kind or "v5p" in kind:
        return 2
    return 1  # v5e / v6e: single TensorCore per chip.


def _margin_ranking_kernel(margin_ref, pos_ref, neg_ref, out_ref, acc_ref, *,
                           tile_rows, valid_rows, apply_mask):
    p = pl.program_id(0)                      # chunk ("parallel") axis
    t = pl.program_id(1)                      # tile ("arbitrary"/reduction) axis
    tiles_per_chunk = pl.num_programs(1)

    @pl.when(t == 0)
    def _():
        acc_ref[...] = jnp.zeros_like(acc_ref)

    # (tile_rows, 128) blocks; widen to f32 on-chip (no HBM-side cast).
    pos = pos_ref[...].astype(jnp.float32)
    neg = neg_ref[...].astype(jnp.float32)
    hinge = jnp.maximum((pos - neg) + margin_ref[0], 0.0)

    if apply_mask:
        # Zero out rows beyond the true row count (partial last tile and the
        # clamped duplicate tile of the last chunk).  jnp.where is a select,
        # so garbage/NaN in out-of-bounds rows cannot leak into the sum.
        row_start = (p * tiles_per_chunk + t) * tile_rows
        row_ids = row_start + jax.lax.broadcasted_iota(
            jnp.int32, (tile_rows, _LANES), 0)
        hinge = jnp.where(row_ids < valid_rows, hinge, 0.0)

    # Fold rows into the (8,128) accumulator: vreg-wise VPU adds only, no
    # cross-lane (XLU) work on the hot path.
    acc_ref[...] += hinge.reshape(
        tile_rows // _SUBLANES, _SUBLANES, _LANES).sum(axis=0)

    @pl.when(t == tiles_per_chunk - 1)
    def _():
        # One cross-lane reduce per chunk (XLU slot is idle in this
        # DMA-bound kernel); emit a single per-chunk scalar.
        col = acc_ref[...].sum(axis=0, keepdims=True)            # (1, 128)
        out_ref[...] = col.sum(axis=1, keepdims=True).reshape(1, 1, 1)


def margin_ranking_loss(positive_scores, negative_scores, margin, *,
                        block_bytes=2 * 1024 * 1024,
                        min_pallas_elems=128 * 1024):
    """Pallas implementation of nn.MarginRankingLoss(margin) with target=-1."""
    assert positive_scores.shape == negative_scores.shape
    n = positive_scores.size
    pos_flat = jnp.ravel(positive_scores)
    neg_flat = jnp.ravel(negative_scores)
    margin_f32 = jnp.asarray(margin, dtype=jnp.float32)

    # Small-N fallback: pallas_call launch + per-step overhead dominates below
    # ~1e5 elements; the fused XLA path is strictly faster there.
    if n < max(min_pallas_elems, _LANES):
        return _hinge_sum_f32(pos_flat, neg_flat, margin_f32) / jnp.float32(n)

    # The kernel only sees whole 128-lane rows; a sub-128 remainder goes to a
    # tiny fused epilogue (no jnp.pad of the full inputs).
    rem = n % _LANES
    n_main = n - rem
    rows = n_main // _LANES

    if rem == 0:
        # Pure metadata reshape of the flat buffer: zero extra HBM traffic.
        pos2d = pos_flat.reshape(rows, _LANES)
        neg2d = neg_flat.reshape(rows, _LANES)
        tail = jnp.float32(0.0)
    else:
        # TODO(synk): the prefix slice may still cost XLA a copy of each input;
        # a manual-DMA 1-D path would make the non-multiple-of-128 case
        # zero-copy as well.
        pos2d = pos_flat[:n_main].reshape(rows, _LANES)
        neg2d = neg_flat[:n_main].reshape(rows, _LANES)
        tail = _hinge_sum_f32(pos_flat[n_main:], neg_flat[n_main:], margin_f32)

    itemsize = jnp.dtype(positive_scores.dtype).itemsize
    sub_pack = max(_SUBLANES, 32 // itemsize)      # 8 f32 / 16 bf16 / 32 int8

    # Tile sized by f32-widened bytes (~2 MiB per input block): ~85-90% of the
    # HBM roofline on all generations, and bounded in-kernel temporaries.
    tile_rows = max(sub_pack,
                    (block_bytes // (_LANES * 4)) // sub_pack * sub_pack)
    tile_rows = min(tile_rows, _round_up(rows, sub_pack))
    total_tiles = pl.cdiv(rows, tile_rows)

    # 2 chunks only on dual-TC chips and only with several full tiles each.
    num_chunks = 2 if (_tensorcores_per_chip() >= 2 and total_tiles >= 8) else 1
    tiles_per_chunk = pl.cdiv(total_tiles, num_chunks)
    apply_mask = (num_chunks * tiles_per_chunk * tile_rows) != rows
    last_block = total_tiles - 1

    def _in_map(p, t):
        # Clamp so the (rare) extra tile of the last chunk re-reads an
        # in-bounds block; its contribution is masked to zero in-kernel.
        return (jnp.minimum(p * tiles_per_chunk + t, last_block), 0)

    kernel = functools.partial(
        _margin_ranking_kernel,
        tile_rows=tile_rows, valid_rows=rows, apply_mask=apply_mask)

    partials = pl.pallas_call(
        kernel,
        out_shape=jax.ShapeDtypeStruct((num_chunks, 1, 1), jnp.float32),
        grid_spec=pltpu.PrefetchScalarGridSpec(
            num_scalar_prefetch=0,
            grid=(num_chunks, tiles_per_chunk),
            in_specs=[
                pl.BlockSpec(memory_space=pltpu.MemorySpace.SMEM),  # margin
                pl.BlockSpec((tile_rows, _LANES), _in_map),
                pl.BlockSpec((tile_rows, _LANES), _in_map),
            ],
            out_specs=pl.BlockSpec((1, 1, 1), lambda p, t: (p, 0, 0)),
            scratch_shapes=[pltpu.VMEM((_SUBLANES, _LANES), jnp.float32)],
        ),
        compiler_params=pltpu.CompilerParams(
            dimension_semantics=("parallel", "arbitrary"),
            vmem_limit_bytes=32 * 1024 * 1024),
    )(margin_f32.reshape(1), pos2d, neg2d)

    # Mean with the *true* element count N.
    return (jnp.sum(partials) + tail) / jnp.float32(n)


if __name__ == "__main__":
    key = jax.random.PRNGKey(0)
    k1, k2, k3, k4 = jax.random.split(key, 4)
    margin = 1.0

    def reference(pos, neg):
        return jnp.mean(jnp.maximum(pos - neg + margin, 0.0))

    # Case 1: batch a multiple of 128 -> zero-copy (rows, 128) view.  Pallas
    # path forced (min_pallas_elems=0) so the kernel itself is exercised.
    b1 = 4096
    pos1 = jax.random.normal(k1, (b1,), dtype=jnp.float32)
    neg1 = jax.random.normal(k2, (b1,), dtype=jnp.float32)
    loss1 = jax.block_until_ready(
        margin_ranking_loss(pos1, neg1, margin, min_pallas_elems=0))
    ref1 = reference(pos1, neg1)
    assert jnp.allclose(loss1, ref1, atol=1e-5, rtol=1e-5), (loss1, ref1)

    # Case 2: batch NOT a multiple of 128 -> in-kernel row masking + tiny
    # fused tail epilogue.
    b2 = 1000
    pos2 = jax.random.normal(k3, (b2,), dtype=jnp.float32)
    neg2 = jax.random.normal(k4, (b2,), dtype=jnp.float32)
    loss2 = jax.block_until_ready(
        margin_ranking_loss(pos2, neg2, margin, min_pallas_elems=0))
    ref2 = reference(pos2, neg2)
    assert jnp.allclose(loss2, ref2, atol=1e-5, rtol=1e-5), (loss2, ref2)

    # Case 3: demo-sized TransE batch takes the fused small-N fallback.
    b3 = 128
    pos3 = jax.random.normal(k1, (b3,), dtype=jnp.float32)
    neg3 = jax.random.normal(k2, (b3,), dtype=jnp.float32)
    loss3 = jax.block_until_ready(margin_ranking_loss(pos3, neg3, margin))
    ref3 = reference(pos3, neg3)
    assert jnp.allclose(loss3, ref3, atol=1e-5, rtol=1e-5), (loss3, ref3)

    print("KERNEL_OK")
</pallas_src>

<mosaic_0001>
module attributes {stable_mosaic.version = 11 : i64} {
  func.func @_margin_ranking_kernel(%arg0: i32, %arg1: i32, %arg2: memref<1xf32, #tpu.memory_space<smem>>, %arg3: memref<32x128xf32, #tpu.memory_space<vmem>>, %arg4: memref<32x128xf32, #tpu.memory_space<vmem>>, %arg5: memref<1x1x1xf32, #tpu.memory_space<vmem>>, %arg6: memref<8x128xf32, #tpu.memory_space<vmem>>) attributes {dimension_semantics = [#tpu.dimension_semantics<parallel>, #tpu.dimension_semantics<arbitrary>], iteration_bounds = array<i64: 1, 1>, scalar_prefetch = 0 : i64, scratch_operands = 1 : i64, tpu.core_type = #tpu.core_type<tc>, window_params = [{transform_indices = @transform_0, window_bounds = array<i64: 1>}, {transform_indices = @transform_1, window_bounds = array<i64: 32, 128>}, {transform_indices = @transform_2, window_bounds = array<i64: 32, 128>}, {transform_indices = @transform_3, window_bounds = array<i64: 1, 1, 1>}]} {
    %c0_i32 = arith.constant 0 : i32
    %0 = arith.cmpi eq, %arg1, %c0_i32 : i32
    %1 = arith.extui %0 : i1 to i32
    %c0_i32_0 = arith.constant 0 : i32
    %2 = arith.cmpi ne, %1, %c0_i32_0 : i32
    scf.if %2 {
      %cst_12 = arith.constant 0.000000e+00 : f32
      %19 = vector.broadcast %cst_12 : f32 to vector<8x128xf32>
      %c0_13 = arith.constant 0 : index
      %c0_14 = arith.constant 0 : index
      %20 = vector.load %arg6[%c0_13, %c0_14] : memref<8x128xf32, #tpu.memory_space<vmem>>, vector<8x128xf32>
      tpu.vector_store %arg6[%c0_13, %c0_14], %19 {strides = array<i32>} : memref<8x128xf32, #tpu.memory_space<vmem>>, vector<8x128xf32>,
    } else {
    }
    %c0 = arith.constant 0 : index
    %c0_1 = arith.constant 0 : index
    %3 = vector.load %arg3[%c0, %c0_1] : memref<32x128xf32, #tpu.memory_space<vmem>>, vector<32x128xf32>
    %c0_2 = arith.constant 0 : index
    %c0_3 = arith.constant 0 : index
    %4 = vector.load %arg4[%c0_2, %c0_3] : memref<32x128xf32, #tpu.memory_space<vmem>>, vector<32x128xf32>
    %5 = arith.subf %3, %4 : vector<32x128xf32>
    %c0_4 = arith.constant 0 : index
    %6 = memref.load %arg2[%c0_4] : memref<1xf32, #tpu.memory_space<smem>>
    %7 = vector.broadcast %6 : f32 to vector<32x128xf32>
    %8 = arith.addf %5, %7 : vector<32x128xf32>
    %cst = arith.constant 0.000000e+00 : f32
    %9 = vector.broadcast %cst : f32 to vector<32x128xf32>
    %10 = arith.maximumf %8, %9 : vector<32x128xf32>
    %c0_5 = arith.constant 0 : index
    %c0_6 = arith.constant 0 : index
    %11 = vector.load %arg6[%c0_5, %c0_6] : memref<8x128xf32, #tpu.memory_space<vmem>>, vector<8x128xf32>
    %12 = vector.shape_cast %10 : vector<32x128xf32> to vector<4x8x128xf32>
    %cst_7 = arith.constant dense<0.000000e+00> : vector<8x128xf32>
    %13 = vector.multi_reduction <add>, %12, %cst_7 [0] : vector<4x8x128xf32> to vector<8x128xf32>
    %14 = arith.addf %11, %13 : vector<8x128xf32>
    %c0_8 = arith.constant 0 : index
    %c0_9 = arith.constant 0 : index
    %15 = vector.load %arg6[%c0_8, %c0_9] : memref<8x128xf32, #tpu.memory_space<vmem>>, vector<8x128xf32>
    tpu.vector_store %arg6[%c0_8, %c0_9], %14 {strides = array<i32>} : memref<8x128xf32, #tpu.memory_space<vmem>>, vector<8x128xf32>,
    %c0_i32_10 = arith.constant 0 : i32
    %16 = arith.cmpi eq, %arg1, %c0_i32_10 : i32
    %17 = arith.extui %16 : i1 to i32
    %c0_i32_11 = arith.constant 0 : i32
    %18 = arith.cmpi ne, %17, %c0_i32_11 : i32
    scf.if %18 {
      %c0_12 = arith.constant 0 : index
      %c0_13 = arith.constant 0 : index
      %19 = vector.load %arg6[%c0_12, %c0_13] : memref<8x128xf32, #tpu.memory_space<vmem>>, vector<8x128xf32>
      %cst_14 = arith.constant dense<0.000000e+00> : vector<128xf32>
      %20 = vector.multi_reduction <add>, %19, %cst_14 [0] : vector<8x128xf32> to vector<128xf32>
      %21 = vector.shape_cast %20 : vector<128xf32> to vector<1x128xf32>
      %cst_15 = arith.constant dense<0.000000e+00> : vector<1xf32>
      %22 = vector.multi_reduction <add>, %21, %cst_15 [1] : vector<1x128xf32> to vector<1xf32>
      %23 = vector.shape_cast %22 : vector<1xf32> to vector<1x1xf32>
      %24 = vector.shape_cast %23 : vector<1x1xf32> to vector<1x1x1xf32>
      %c0_16 = arith.constant 0 : index
      %c0_17 = arith.constant 0 : index
      %c0_18 = arith.constant 0 : index
      %25 = vector.load %arg5[%c0_16, %c0_17, %c0_18] : memref<1x1x1xf32, #tpu.memory_space<vmem>>, vector<1x1x1xf32>
      tpu.vector_store %arg5[%c0_16, %c0_17, %c0_18], %24 {strides = array<i32>} : memref<1x1x1xf32, #tpu.memory_space<vmem>>, vector<1x1x1xf32>,
    } else {
    }
    return
  }
  func.func @transform_0(%arg0: i32, %arg1: i32) -> i32 {
    %c0_i32 = arith.constant 0 : i32
    %c0_i32_0 = arith.constant 0 : i32
    return %c0_i32 : i32
  }
  func.func @transform_1(%arg0: i32, %arg1: i32) -> (i32, i32) {
    %c1_i32 = arith.constant 1 : i32
    %0 = arith.muli %arg0, %c1_i32 : i32
    %1 = arith.addi %0, %arg1 : i32
    %c0_i32 = arith.constant 0 : i32
    %2 = arith.minsi %1, %c0_i32 : i32
    %c0_i32_0 = arith.constant 0 : i32
    %c0_i32_1 = arith.constant 0 : i32
    return %2, %c0_i32_0 : i32, i32
  }
  func.func @transform_2(%arg0: i32, %arg1: i32) -> (i32, i32) {
    %c1_i32 = arith.constant 1 : i32
    %0 = arith.muli %arg0, %c1_i32 : i32
    %1 = arith.addi %0, %arg1 : i32
    %c0_i32 = arith.constant 0 : i32
    %2 = arith.minsi %1, %c0_i32 : i32
    %c0_i32_0 = arith.constant 0 : i32
    %c0_i32_1 = arith.constant 0 : i32
    return %2, %c0_i32_0 : i32, i32
  }
  func.func @transform_3(%arg0: i32, %arg1: i32) -> (i32, i32, i32) {
    %c0_i32 = arith.constant 0 : i32
    %c0_i32_0 = arith.constant 0 : i32
    %c0_i32_1 = arith.constant 0 : i32
    return %arg0, %c0_i32, %c0_i32_0 : i32, i32, i32
  }
}

</mosaic_0001>

<bundles_post_ra>
// kernel: tpu_custom_call.1
= control target key start
LH: loop header
LB: loop body
LE: loop exit
PB: predicated region body
PF: predicated region fallthrough
CT: control target
= control target key end

     0   :  { %9 = vsyncpa [#allocation5], 0  ;;  %s257_s0 = inlined_call_operand.<no memory space> [shape: f32[1], index: 0, kind: input, shape index: {}]   ;;  %s258_s1 = inlined_call_operand.hbm [shape: f32[32,128], index: 1, kind: input, shape index: {}]   ;;  %s259_s2 = inlined_call_operand.hbm [shape: f32[32,128], index: 2, kind: input, shape index: {}]   ;;  %s260_s3 = inlined_call_operand.hbm [shape: f32[1,1,1], index: 3, kind: output, shape index: {}]  }
   0x1   :  { %10 = vsyncpa [#allocation8], 0 }
   0x2   :  { %11 = vsyncpa [#allocation6], 0  ;;  %s24_s14 = sshll.u32 %s258_s1, 4  ;;  %s220_s15 = smov [#allocation4]   ;;  %s25_s14 = int_to_ptr.hbm [resolvable:$true] %s24_s14 }
   0x3   :  { %s26_s16 = sshll.u32 %s220_s15, 4  ;;  %s43_s19 = sshll.u32 %s259_s2, 4  ;;  %s27_s16 = int_to_ptr.vmem [resolvable:$true] %s26_s16  ;;  %s44_s19 = int_to_ptr.hbm [resolvable:$true] %s43_s19 }
   0x4   :  { %s221_s20 = smov 128   ;;  %s222_s21 = smov 8  }
   0x5   :  { %32 = dma.hbm_to_vmem [thread:$0]  %s25_s14, 512, %s27_s16, [#allocation5], %s221_s20, %s221_s20, %s222_s21  }
   0x6   :  { %s223_s22 = smov [#allocation7]  }
   0x7   :  { %s45_s23 = sshll.u32 %s223_s22, 4  ;;  %s46_s23 = int_to_ptr.vmem [resolvable:$true] %s45_s23 }
   0x8   :  { %51 = dma.hbm_to_vmem [thread:$0]  %s44_s19, 512, %s46_s23, [#allocation8], %s221_s20, %s221_s20, %s222_s21  }
   0x9   :  { %214 = dma.done.wait [#allocation5], 512  }
   0xa   :  { %215 = vsyncadd [#allocation5], 4294966784 }
   0xb   :  { %216 = dma.done.wait [#allocation8], 512  }
   0xc   :  { %217 = vsyncadd [#allocation8], 4294966784  ;;  %v73_v0 = vld [vmem:[#allocation4] sm:$0xff]  ;;  %v74_v1 = vld [vmem:[#allocation4 + $0x8] sm:$0xff]  ;;  %v86_v6 = vstv %s257_s0  ;;  %s224_s0 = smov [#allocation9]   ;;  %s122_s27 = sshll.u32 %s260_s3, 4  ;;  %s123_s27 = int_to_ptr.hbm [resolvable:$true] %s122_s27 }
   0xd   :  { %v75_v2 = vld [vmem:[#allocation4 + $0x10] sm:$0xff]  ;;  %v76_v3 = vld [vmem:[#allocation4 + $0x18] sm:$0xff]  ;;  %v77_v4 = vld [vmem:[#allocation7] sm:$0xff]  ;;  %s120_s24 = sshll.u32 %s224_s0, 4  ;;  %vm113_vm0 = vcmask 0   ;;  %s121_s24 = int_to_ptr.vmem [resolvable:$true] %s120_s24 }
   0xe   :  { %v78_v5 = vld [vmem:[#allocation7 + $0x8] sm:$0xff]  ;;  %v79_v7 = vld [vmem:[#allocation7 + $0x10] sm:$0xff]  ;;  %v80_v8 = vld [vmem:[#allocation7 + $0x18] sm:$0xff]  ;;  %v81_v9 = vsub.f32 %v73_v0, %v77_v4 }
   0xf   :  { %v82_v10 = vsub.f32 %v74_v1, %v78_v5  ;;  %v83_v11 = vsub.f32 %v75_v2, %v79_v7  ;;  %v84_v12 = vsub.f32 %v76_v3, %v80_v8 }
  0x10   :  { %v87_v13 = vadd.f32 %v86_v6, %v81_v9 }
  0x11   :  { %v88_v14 = vadd.f32 %v86_v6, %v82_v10  ;;  %v89_v15 = vadd.f32 %v86_v6, %v83_v11  ;;  %v90_v16 = vadd.f32 %v86_v6, %v84_v12 }
  0x12   :  { %v91_v17 = vmax.f32 %v87_v13, 0.0 }
  0x13   :  { %v92_v18 = vmax.f32 %v88_v14, 0.0  ;;  %v93_v19 = vmax.f32 %v89_v15, 0.0  ;;  %v94_v20 = vmax.f32 %v90_v16, 0.0 }
  0x15   :  { %v96_v21 = vadd.f32 %v92_v18, %v91_v17 }
  0x17   :  { %v97_v22 = vadd.f32 %v96_v21, %v93_v19 }
  0x19   :  { %v98_v23 = vadd.f32 %v97_v22, %v94_v20 }
  0x1b   :  { %v105_v24 = vrot.slane %v98_v23, 4 }
  0x1d   :  { %v106_v25 = vadd.f32 %v105_v24, %v98_v23 }
  0x1f   :  { %v107_v26 = vrot.slane %v106_v25, 2 }
  0x21   :  { %v108_v27 = vadd.f32 %v107_v26, %v106_v25 }
  0x23   :  { %v109_v28 = vrot.slane %v108_v27, 1 }
  0x25   :  { %v110_v29 = vadd.f32 %v109_v28, %v108_v27 }
  0x27   :  { %111 = vadd.xlane.f32.xlu0 %v110_v29 }
  0x9a   :  { %v112_v30 = vpop.xlane.xlu0 %111 }
  0x9b   :  { %114 = vst.msk [vmem:[#allocation9] sm:$0x1] %vm113_vm0, %v112_v30 }
  0x9c   :  { %125 = dma.vmem_to_hbm [thread:$0]  %s121_s24, 16, %s123_s27, [#allocation6]  }
  0x9d   :  { %218 = dma.done.wait [#allocation6], 16  }
  0x9e   :  { %219 = vsyncadd [#allocation6], 4294967280 }
  0x9f   :  { %130 = vsyncpa [#allocation5], 1 }
  0xa0   :  { %131 = vsyncpa [#allocation8], 1 }
  0xa1   :  { %132 = vsyncpa [#allocation6], 1 }

</bundles_post_ra>
